<compile_context>
chip_gen: v7x
topology: tpu7x:2x2x1
jax: 0.10.0
libtpu: 0.0.40
codegen_flags: <defaults>
</compile_context>

<pallas_src>
import jax
import jax.numpy as jnp
from jax.experimental import pallas as pl
from jax.experimental.pallas import tpu as pltpu


# ----------------------------------------------------------------------------
# Pallas kernel: single HBM->HBM DMA copy.  Only used when a physical
# materialization of the (identity) output is genuinely required.
# ----------------------------------------------------------------------------
def _dma_copy_kernel(x_ref, o_ref, sem):
    # Both refs stay in their home memory space (pl.ANY -> HBM): one
    # whole-array DMA, no VMEM staging, no vld/vst slot work, no grid.
    cp = pltpu.make_async_copy(x_ref, o_ref, sem)
    cp.start()
    cp.wait()


def pallas_materialize(x):
    """Physical identity copy of `x` via a single HBM->HBM DMA."""
    nbytes = x.size * jnp.dtype(x.dtype).itemsize
    return pl.pallas_call(
        _dma_copy_kernel,
        out_shape=jax.ShapeDtypeStruct(x.shape, x.dtype),
        in_specs=[pl.BlockSpec(memory_space=pl.ANY)],
        out_specs=pl.BlockSpec(memory_space=pl.ANY),
        scratch_shapes=[pltpu.SemaphoreType.DMA],
        cost_estimate=pl.CostEstimate(
            flops=0,
            transcendentals=0,
            bytes_accessed=2 * nbytes,
        ),
    )(x)


def pallas_identity(x, materialize=False):
    """Identity pass-through of an arbitrary-shape tensor.

    Default (materialize=False): returns `x` unchanged — no kernel, no HBM
    traffic.  With materialize=True, performs a physical copy via a single
    HBM->HBM DMA Pallas kernel (roofline-bound on all TPU generations).
    """
    if not materialize:
        return x
    return pallas_materialize(x)


# ----------------------------------------------------------------------------
# Lightweight JAX-side mirrors of Proxy / ProxyLayer plumbing.
# ----------------------------------------------------------------------------
class Proxy:
    """Minimal weight provider mirroring candle.proxy.Proxy."""

    def __init__(self, params):
        self.child = None
        self._proxy_layer = None
        self._params = list(params)

    def parameters(self):
        return self._params

    def buffers(self):
        return []

    @property
    def root(self):
        return self

    @property
    def proxy_layer(self):
        return self._proxy_layer

    @proxy_layer.setter
    def proxy_layer(self, layer):
        self._proxy_layer = layer


class Registry:
    def __init__(self):
        self.proxies = []

    def register_proxy(self, proxy_type, proxy):
        self.proxies.append((proxy_type, proxy))


class ProxyLayer:
    """JAX/Pallas mirror of candle.proxy.ProxyLayer (no hooks registered)."""

    def __init__(self, weight_provider, registry=None, materialize_output=False):
        self.weight_provider = weight_provider
        self.weight_provider.proxy_layer = self
        self.output_proxy = None
        self.input_proxy = None
        self.registry = registry or Registry()
        self.materialize_output = materialize_output
        self._param_idx = 0
        self.params = {}
        self._register_all_params("weight_provider", weight_provider)

    def _register_all_params(self, proxy_type, proxy):
        self.registry.register_proxy(proxy_type, proxy)
        params = list(proxy.parameters())
        for i, p in enumerate(params):
            self.params[f"proxy.{self._param_idx + i}"] = p
        self._param_idx += len(params)

    def apply_input_hook(self, args):
        if self.input_proxy is None:
            return args
        return self.input_proxy(args)

    def apply_output_hook(self, out):
        if self.output_proxy is None:
            return out
        return self.output_proxy(out)

    def on_forward(self, x):
        # TODO(synk): `on_forward` is abstract (raises NotImplementedError) in
        # the reference; the only defined forward path is the identity.  We
        # short-circuit it by default and only run the DMA-copy Pallas kernel
        # when a physical materialization is explicitly requested.
        return pallas_identity(x, materialize=self.materialize_output)

    def forward(self, *args, **kwargs):
        args = self.apply_input_hook(args)
        out = self.on_forward(*args, **kwargs)
        out = self.apply_output_hook(out)
        return out

    def __call__(self, *args, **kwargs):
        return self.forward(*args, **kwargs)

    @property
    def lr_scale(self):
        return 1

    @property
    def param_options(self):
        return dict(lr_scale=self.lr_scale)


# ----------------------------------------------------------------------------
# Demo
# ----------------------------------------------------------------------------
if __name__ == "__main__":
    key = jax.random.PRNGKey(0)
    kx, kw = jax.random.split(key)

    # Small NCHW input: batch=2, channels=4, spatial=16x16.
    x = jax.random.normal(kx, (2, 4, 16, 16), dtype=jnp.float32)

    # Parameter held by the weight provider (registered but, per the base-class
    # semantics, not consumed by forward()).
    w = jax.random.normal(kw, (4, 4), dtype=jnp.float32)

    # Fast path: identity short-circuit (no kernel launch).
    provider_fast = Proxy([w])
    layer_fast = ProxyLayer(provider_fast, registry=Registry())
    out_fast = jax.block_until_ready(layer_fast(x))
    assert out_fast.shape == x.shape and out_fast.dtype == x.dtype
    assert jnp.allclose(out_fast, x)

    # Materializing path: runs the HBM->HBM DMA Pallas kernel once.
    provider_dma = Proxy([w])
    layer_dma = ProxyLayer(provider_dma, registry=Registry(),
                           materialize_output=True)
    out_dma = jax.block_until_ready(layer_dma(x))
    assert out_dma.shape == x.shape and out_dma.dtype == x.dtype
    assert jnp.allclose(out_dma, x)

    print("KERNEL_OK")
</pallas_src>

<mosaic_0001>
module attributes {stable_mosaic.version = 11 : i64} {
  func.func @_dma_copy_kernel(%arg0: memref<2x4x16x16xf32, #tpu.memory_space<any>>, %arg1: memref<2x4x16x16xf32, #tpu.memory_space<any>>, %arg2: memref<!tpu.dma_semaphore, #tpu.memory_space<semaphore_mem>>) attributes {dimension_semantics = [], scalar_prefetch = 0 : i64, scratch_operands = 1 : i64, tpu.core_type = #tpu.core_type<tc>} {
    tpu.enqueue_dma source(%arg0 : memref<2x4x16x16xf32, #tpu.memory_space<any>>) target(%arg1 : memref<2x4x16x16xf32, #tpu.memory_space<any>>) target_semaphore(%arg2 : memref<!tpu.dma_semaphore, #tpu.memory_space<semaphore_mem>>)
    tpu.wait_dma2 semaphore(%arg2 : memref<!tpu.dma_semaphore, #tpu.memory_space<semaphore_mem>>) src(%arg0 : memref<2x4x16x16xf32, #tpu.memory_space<any>>) dst(%arg1 : memref<2x4x16x16xf32, #tpu.memory_space<any>>)
    return
  }
}

</mosaic_0001>

<bundles_post_ra>
// kernel: tpu_custom_call.1
= control target key start
LH: loop header
LB: loop body
LE: loop exit
PB: predicated region body
PF: predicated region fallthrough
CT: control target
= control target key end

     0   :  { %s36_s6 = smov [#allocation2]   ;;  %s37_s7 = smov [#allocation3]   ;;  %s55_s0 = inlined_call_operand.hbm [shape: f32[2,4,16,16], index: 0, kind: input, shape index: {}]   ;;  %s56_s1 = inlined_call_operand.hbm [shape: f32[2,4,16,16], index: 1, kind: output, shape index: {}]  }
   0x1   :  { %s38_s8 = smov 0  }
   0x2   :  { %18 = dma.general %s55_s0, 2048, %s56_s1, %s36_s6, %s37_s7, [#allocation4], %s38_s8, 0  }
   0x3   :  { %34 = dma.done.wait [#allocation2], 2048 }
   0x4   :  { %35 = vsyncadd [#allocation2], 4294965248 }
   0x5   :  { %24 = vsyncmov [#allocation2] }
   0x8   :  { %s25_s13 = vpop.sfrf %24 }
   0x9   :  { %p30_p0 = scmp.ne.s32.totalorder %s25_s13, 0 }
   0xb   :  { %29 = shalt.err (%p30_p0)  }

</bundles_post_ra>
